<compile_context>
chip_gen: v7x
topology: tpu7x:2x2x1
jax: 0.10.0
libtpu: 0.0.40
codegen_flags: <defaults>
</compile_context>

<pallas_src>
import functools
import math

import jax
import jax.numpy as jnp
from jax import lax
from jax.experimental import pallas as pl
from jax.experimental.pallas import tpu as pltpu


_VMEM_LIMIT = 32 * 1024 * 1024  # explicit, safe on v5e/v6e/v7x at these shapes


def _gelu(x):
    # exact (erf) GELU, as in BERT
    return 0.5 * x * (1.0 + lax.erf(x * 0.7071067811865476))


def _layernorm(x, g, b, eps):
    mu = jnp.mean(x, axis=-1, keepdims=True)
    var = jnp.mean((x - mu) ** 2, axis=-1, keepdims=True)
    return (x - mu) * lax.rsqrt(var + eps) * g + b


# --------------------- kernel: LayerNorm (no residual) ----------------------

def _layernorm_kernel(x_ref, g_ref, b_ref, o_ref, *, eps):
    x = x_ref[...].astype(jnp.float32)
    o_ref[...] = _layernorm(x, g_ref[...], b_ref[...], eps).astype(o_ref.dtype)


def layernorm(x2d, gamma, beta, *, tile_m, eps=1e-12):
    M, H = x2d.shape
    return pl.pallas_call(
        functools.partial(_layernorm_kernel, eps=eps),
        out_shape=jax.ShapeDtypeStruct((M, H), x2d.dtype),
        grid_spec=pltpu.PrefetchScalarGridSpec(
            num_scalar_prefetch=0,
            grid=(M // tile_m,),
            in_specs=[
                pl.BlockSpec((tile_m, H), lambda i: (i, 0)),
                pl.BlockSpec((1, H), lambda i: (0, 0)),
                pl.BlockSpec((1, H), lambda i: (0, 0)),
            ],
            out_specs=pl.BlockSpec((tile_m, H), lambda i: (i, 0)),
        ),
        compiler_params=pltpu.CompilerParams(
            dimension_semantics=("parallel",),
            vmem_limit_bytes=_VMEM_LIMIT,
        ),
    )(x2d, gamma.reshape(1, H), beta.reshape(1, H))


# --------- kernel: fused QKV proj + attention + out-proj + add + LN ---------

def _attn_block_kernel(h_ref, bias_ref, wqkv_ref, bqkv_ref, wo_ref, bo_ref,
                       g_ref, b_ref, o_ref, *, num_heads, head_dim, eps):
    # h_ref: [S, H] for one batch row; bias_ref: [1, 1, S] additive mask bias.
    x = h_ref[...].astype(jnp.float32)                       # [S, H]
    H = num_heads * head_dim
    scale = 1.0 / math.sqrt(head_dim)

    # Fused QKV projection: one MXU matmul with N = 3H.
    qkv = jnp.dot(x, wqkv_ref[...],
                  preferred_element_type=jnp.float32) + bqkv_ref[...]  # [S, 3H]

    bias = bias_ref[0]                                       # [1, S], broadcasts over rows

    # Per-head attention via lane slices of qkv; output projection accumulated
    # per head (avoids materializing [S, H] context concat and head transposes).
    attn = jnp.zeros_like(x)                                 # [S, H]
    for hh in range(num_heads):
        lo = hh * head_dim
        qh = qkv[:, lo:lo + head_dim]                        # [S, hd]
        kh = qkv[:, H + lo:H + lo + head_dim]
        vh = qkv[:, 2 * H + lo:2 * H + lo + head_dim]
        s = lax.dot_general(qh, kh, (((1,), (1,)), ((), ())),
                            preferred_element_type=jnp.float32) * scale + bias
        m = jnp.max(s, axis=-1, keepdims=True)
        p = jnp.exp(s - m)
        p = p * pl.reciprocal(jnp.sum(p, axis=-1, keepdims=True), approx=True)
        ctx_h = jnp.dot(p, vh, preferred_element_type=jnp.float32)    # [S, hd]
        w_h = wo_ref[lo:lo + head_dim, :]                              # [hd, H]
        attn = attn + jnp.dot(ctx_h, w_h, preferred_element_type=jnp.float32)

    y = attn + bo_ref[...] + x                               # out-proj bias + residual
    o_ref[...] = _layernorm(y, g_ref[...], b_ref[...], eps).astype(o_ref.dtype)


def attn_block(h2d, bias3d, wqkv, bqkv, wo, bo, gamma, beta,
               *, B, S, num_heads, head_dim, eps=1e-12):
    H = num_heads * head_dim
    return pl.pallas_call(
        functools.partial(_attn_block_kernel, num_heads=num_heads,
                          head_dim=head_dim, eps=eps),
        out_shape=jax.ShapeDtypeStruct((B * S, H), h2d.dtype),
        grid_spec=pltpu.PrefetchScalarGridSpec(
            num_scalar_prefetch=0,
            grid=(B,),
            in_specs=[
                pl.BlockSpec((S, H), lambda b: (b, 0)),          # activations
                pl.BlockSpec((1, 1, S), lambda b: (b, 0, 0)),    # mask bias
                pl.BlockSpec((H, 3 * H), lambda b: (0, 0)),      # fused QKV weight
                pl.BlockSpec((1, 3 * H), lambda b: (0, 0)),
                pl.BlockSpec((H, H), lambda b: (0, 0)),          # out-proj weight
                pl.BlockSpec((1, H), lambda b: (0, 0)),
                pl.BlockSpec((1, H), lambda b: (0, 0)),          # LN gamma
                pl.BlockSpec((1, H), lambda b: (0, 0)),          # LN beta
            ],
            out_specs=pl.BlockSpec((S, H), lambda b: (b, 0)),
        ),
        compiler_params=pltpu.CompilerParams(
            dimension_semantics=("parallel",),
            vmem_limit_bytes=_VMEM_LIMIT,
        ),
    )(h2d, bias3d, wqkv, bqkv, wo, bo.reshape(1, H),
      gamma.reshape(1, H), beta.reshape(1, H))


# -------------- kernel: fused FFN (up + GELU + down) + add + LN -------------

def _ffn_block_kernel(h_ref, wi_ref, bi_ref, wo_ref, bo_ref, g_ref, b_ref,
                      o_ref, *, eps):
    x = h_ref[...].astype(jnp.float32)                       # [M, H]
    inter = jnp.dot(x, wi_ref[...],
                    preferred_element_type=jnp.float32) + bi_ref[...]
    inter = _gelu(inter)
    ffn = jnp.dot(inter, wo_ref[...],
                  preferred_element_type=jnp.float32) + bo_ref[...]
    y = ffn + x
    o_ref[...] = _layernorm(y, g_ref[...], b_ref[...], eps).astype(o_ref.dtype)


def ffn_block(h2d, wi, bi, wo2, bo2, gamma, beta, *, tile_m, eps=1e-12):
    M, H = h2d.shape
    I = wi.shape[1]
    return pl.pallas_call(
        functools.partial(_ffn_block_kernel, eps=eps),
        out_shape=jax.ShapeDtypeStruct((M, H), h2d.dtype),
        grid_spec=pltpu.PrefetchScalarGridSpec(
            num_scalar_prefetch=0,
            grid=(M // tile_m,),
            in_specs=[
                pl.BlockSpec((tile_m, H), lambda i: (i, 0)),
                pl.BlockSpec((H, I), lambda i: (0, 0)),
                pl.BlockSpec((1, I), lambda i: (0, 0)),
                pl.BlockSpec((I, H), lambda i: (0, 0)),
                pl.BlockSpec((1, H), lambda i: (0, 0)),
                pl.BlockSpec((1, H), lambda i: (0, 0)),
                pl.BlockSpec((1, H), lambda i: (0, 0)),
            ],
            out_specs=pl.BlockSpec((tile_m, H), lambda i: (i, 0)),
        ),
        compiler_params=pltpu.CompilerParams(
            dimension_semantics=("parallel",),
            vmem_limit_bytes=_VMEM_LIMIT,
        ),
    )(h2d, wi, bi.reshape(1, I), wo2, bo2.reshape(1, H),
      gamma.reshape(1, H), beta.reshape(1, H))


# -------------- kernel: fused pooler (tanh) + classifier head ---------------

def _pooler_head_kernel(cls_ref, pw_ref, pb_ref, cw_ref, cb_ref, lin_ref):
    x = cls_ref[...].astype(jnp.float32)                     # [B, H]
    pooled = jnp.tanh(jnp.dot(x, pw_ref[...],
                              preferred_element_type=jnp.float32) + pb_ref[...])
    # dropout: eval-mode identity.
    # N=1 classifier head: VPU multiply + lane reduction (MXU 1-column matmul
    # would waste the systolic array). ReLU(final_output) is dead -> dropped.
    lin = jnp.sum(pooled * cw_ref[...], axis=-1, keepdims=True) + cb_ref[...]
    lin_ref[...] = lin.astype(lin_ref.dtype)


def pooler_head(cls_tok, pool_w, pool_b, cls_w, cls_b):
    B, H = cls_tok.shape
    return pl.pallas_call(
        _pooler_head_kernel,
        out_shape=jax.ShapeDtypeStruct((B, 1), cls_tok.dtype),
        compiler_params=pltpu.CompilerParams(vmem_limit_bytes=_VMEM_LIMIT),
    )(cls_tok, pool_w, pool_b.reshape(1, H),
      cls_w.reshape(1, H), cls_b.reshape(1, 1))


# ------------------------------ model (glue) -------------------------------

CFG = dict(vocab=100, max_pos=16, hidden=32, layers=2, heads=2, inter=128)


def init_params(key, cfg):
    H, L, I = cfg["hidden"], cfg["layers"], cfg["inter"]
    keys = iter(jax.random.split(key, 8 + 10 * L))
    nrm = lambda shape: 0.02 * jax.random.normal(next(keys), shape, jnp.float32)
    p = {
        "word_emb": nrm((cfg["vocab"], H)),
        "pos_emb": nrm((cfg["max_pos"], H)),
        "type_emb": nrm((2, H)),
        "emb_ln_g": jnp.ones((H,), jnp.float32),
        "emb_ln_b": jnp.zeros((H,), jnp.float32),
        "pool_w": nrm((H, H)),
        "pool_b": jnp.zeros((H,), jnp.float32),
        "cls_w": nrm((H, 1)),
        "cls_b": jnp.zeros((1,), jnp.float32),
        "layers": [],
    }
    for _ in range(L):
        p["layers"].append({
            "wq": nrm((H, H)), "bq": jnp.zeros((H,), jnp.float32),
            "wk": nrm((H, H)), "bk": jnp.zeros((H,), jnp.float32),
            "wv": nrm((H, H)), "bv": jnp.zeros((H,), jnp.float32),
            "wo": nrm((H, H)), "bo": jnp.zeros((H,), jnp.float32),
            "ln1_g": jnp.ones((H,), jnp.float32), "ln1_b": jnp.zeros((H,), jnp.float32),
            "wi": nrm((H, I)), "bi": jnp.zeros((I,), jnp.float32),
            "wo2": nrm((I, H)), "bo2": jnp.zeros((H,), jnp.float32),
            "ln2_g": jnp.ones((H,), jnp.float32), "ln2_b": jnp.zeros((H,), jnp.float32),
        })
    return p


def bert_classifier_forward(params, input_ids, mask, cfg=CFG):
    B, S = input_ids.shape
    H, nh = cfg["hidden"], cfg["heads"]
    hd = H // nh
    tile_m = S  # row-tile for row-wise kernels (B*S % tile_m == 0)

    # --- embeddings (gather = glue) + embedding LayerNorm (Pallas, no residual) ---
    emb = (params["word_emb"][input_ids]
           + params["pos_emb"][jnp.arange(S)][None, :, :]
           + params["type_emb"][0][None, None, :])           # token_type_ids = 0
    h = emb.reshape(B * S, H)
    h = layernorm(h, params["emb_ln_g"], params["emb_ln_b"], tile_m=tile_m)
    # TODO(synk): embedding dropout omitted (eval-mode identity).

    # --- compact additive attention-mask bias [B, 1, S]; broadcast in-kernel ---
    bias = ((1.0 - mask.astype(jnp.float32)) * -10000.0).reshape(B, 1, S)

    # --- encoder layers: 2 fused pallas_calls per layer ---
    for lp in params["layers"]:
        wqkv = jnp.concatenate([lp["wq"], lp["wk"], lp["wv"]], axis=1)   # [H, 3H]
        bqkv = jnp.concatenate([lp["bq"], lp["bk"], lp["bv"]]).reshape(1, 3 * H)
        h = attn_block(h, bias, wqkv, bqkv, lp["wo"], lp["bo"],
                       lp["ln1_g"], lp["ln1_b"],
                       B=B, S=S, num_heads=nh, head_dim=hd)
        h = ffn_block(h, lp["wi"], lp["bi"], lp["wo2"], lp["bo2"],
                      lp["ln2_g"], lp["ln2_b"], tile_m=tile_m)

    # --- pooler: tanh(W @ hidden[:, 0] + b), then dropout(id) + Linear(H,1) ---
    cls = h.reshape(B, S, H)[:, 0, :]                         # [B, H]
    linear_output = pooler_head(cls, params["pool_w"], params["pool_b"],
                                params["cls_w"], params["cls_b"])
    # PyTorch module computes ReLU(final_output) but returns linear_output.
    return linear_output


# --------------------------------- main -----------------------------------

if __name__ == "__main__":
    key = jax.random.PRNGKey(0)
    k_param, k_ids = jax.random.split(key)

    B, S = 2, 8
    params = init_params(k_param, CFG)
    input_ids = jax.random.randint(k_ids, (B, S), 0, CFG["vocab"], dtype=jnp.int32)
    mask = jnp.ones((B, S), dtype=jnp.int32).at[1, -2:].set(0)  # pad last 2 of row 1

    out = bert_classifier_forward(params, input_ids, mask)
    out = jax.block_until_ready(out)
    assert out.shape == (B, 1) and out.dtype == jnp.float32
    print("KERNEL_OK")
</pallas_src>

<mosaic_0001>
module attributes {stable_mosaic.version = 11 : i64} {
  func.func @_layernorm_kernel(%arg0: i32, %arg1: memref<8x32xf32, #tpu.memory_space<vmem>>, %arg2: memref<1x32xf32, #tpu.memory_space<vmem>>, %arg3: memref<1x32xf32, #tpu.memory_space<vmem>>, %arg4: memref<8x32xf32, #tpu.memory_space<vmem>>) attributes {dimension_semantics = [#tpu.dimension_semantics<parallel>], iteration_bounds = array<i64: 2>, scalar_prefetch = 0 : i64, scratch_operands = 0 : i64, tpu.core_type = #tpu.core_type<tc>, window_params = [{transform_indices = @transform_0, window_bounds = array<i64: 8, 32>}, {pipeline_mode = #tpu.pipeline_mode<synchronous>, transform_indices = @transform_1, window_bounds = array<i64: 1, 32>}, {pipeline_mode = #tpu.pipeline_mode<synchronous>, transform_indices = @transform_2, window_bounds = array<i64: 1, 32>}, {transform_indices = @transform_3, window_bounds = array<i64: 8, 32>}]} {
    %c0 = arith.constant 0 : index
    %c0_0 = arith.constant 0 : index
    %0 = vector.load %arg1[%c0, %c0_0] : memref<8x32xf32, #tpu.memory_space<vmem>>, vector<8x32xf32>
    %c0_1 = arith.constant 0 : index
    %c0_2 = arith.constant 0 : index
    %1 = vector.load %arg2[%c0_1, %c0_2] : memref<1x32xf32, #tpu.memory_space<vmem>>, vector<1x32xf32>
    %c0_3 = arith.constant 0 : index
    %c0_4 = arith.constant 0 : index
    %2 = vector.load %arg3[%c0_3, %c0_4] : memref<1x32xf32, #tpu.memory_space<vmem>>, vector<1x32xf32>
    %cst = arith.constant dense<0.000000e+00> : vector<8xf32>
    %3 = vector.multi_reduction <add>, %0, %cst [1] : vector<8x32xf32> to vector<8xf32>
    %4 = vector.shape_cast %3 : vector<8xf32> to vector<8x1xf32>
    %cst_5 = arith.constant 3.200000e+01 : f32
    %5 = vector.broadcast %cst_5 : f32 to vector<8x1xf32>
    %6 = arith.divf %4, %5 : vector<8x1xf32>
    %7 = vector.broadcast %6 : vector<8x1xf32> to vector<8x32xf32>
    %8 = arith.subf %0, %7 : vector<8x32xf32>
    %9 = arith.mulf %8, %8 : vector<8x32xf32>
    %cst_6 = arith.constant dense<0.000000e+00> : vector<8xf32>
    %10 = vector.multi_reduction <add>, %9, %cst_6 [1] : vector<8x32xf32> to vector<8xf32>
    %11 = vector.shape_cast %10 : vector<8xf32> to vector<8x1xf32>
    %cst_7 = arith.constant 3.200000e+01 : f32
    %12 = vector.broadcast %cst_7 : f32 to vector<8x1xf32>
    %13 = arith.divf %11, %12 : vector<8x1xf32>
    %14 = vector.broadcast %6 : vector<8x1xf32> to vector<8x32xf32>
    %15 = arith.subf %0, %14 : vector<8x32xf32>
    %cst_8 = arith.constant 9.99999996E-13 : f32
    %16 = vector.broadcast %cst_8 : f32 to vector<8x1xf32>
    %17 = arith.addf %13, %16 : vector<8x1xf32>
    %18 = math.rsqrt %17 : vector<8x1xf32>
    %19 = vector.broadcast %18 : vector<8x1xf32> to vector<8x32xf32>
    %20 = arith.mulf %15, %19 : vector<8x32xf32>
    %21 = vector.broadcast %1 : vector<1x32xf32> to vector<8x32xf32>
    %22 = arith.mulf %20, %21 : vector<8x32xf32>
    %23 = vector.broadcast %2 : vector<1x32xf32> to vector<8x32xf32>
    %24 = arith.addf %22, %23 : vector<8x32xf32>
    %c0_9 = arith.constant 0 : index
    %c0_10 = arith.constant 0 : index
    %25 = vector.load %arg4[%c0_9, %c0_10] : memref<8x32xf32, #tpu.memory_space<vmem>>, vector<8x32xf32>
    tpu.vector_store %arg4[%c0_9, %c0_10], %24 {strides = array<i32>} : memref<8x32xf32, #tpu.memory_space<vmem>>, vector<8x32xf32>,
    return
  }
  func.func @transform_0(%arg0: i32) -> (i32, i32) {
    %c0_i32 = arith.constant 0 : i32
    %c0_i32_0 = arith.constant 0 : i32
    return %arg0, %c0_i32 : i32, i32
  }
  func.func @transform_1(%arg0: i32) -> (i32, i32) {
    %c0_i32 = arith.constant 0 : i32
    %c0_i32_0 = arith.constant 0 : i32
    %c0_i32_1 = arith.constant 0 : i32
    return %c0_i32, %c0_i32_0 : i32, i32
  }
  func.func @transform_2(%arg0: i32) -> (i32, i32) {
    %c0_i32 = arith.constant 0 : i32
    %c0_i32_0 = arith.constant 0 : i32
    %c0_i32_1 = arith.constant 0 : i32
    return %c0_i32, %c0_i32_0 : i32, i32
  }
  func.func @transform_3(%arg0: i32) -> (i32, i32) {
    %c0_i32 = arith.constant 0 : i32
    %c0_i32_0 = arith.constant 0 : i32
    return %arg0, %c0_i32 : i32, i32
  }
}

</mosaic_0001>

<bundles_post_ra>
// kernel: tpu_custom_call.1
= control target key start
LH: loop header
LB: loop body
LE: loop exit
PB: predicated region body
PF: predicated region fallthrough
CT: control target
= control target key end

     0   :  { %8 = vsyncpa [#allocation3], 0  ;;  %s655_s0 = inlined_call_operand.hbm [shape: f32[16,32], index: 0, kind: input, shape index: {}]   ;;  %s656_s1 = inlined_call_operand.vmem [shape: f32[1,32], index: 1, kind: input, shape index: {}]   ;;  %s657_s2 = inlined_call_operand.vmem [shape: f32[1,32], index: 2, kind: input, shape index: {}]   ;;  %s658_s3 = inlined_call_operand.hbm [shape: f32[16,32], index: 3, kind: output, shape index: {}]  }
   0x1   :  { %10 = vsyncpa [#allocation3 + $0x1], 0 }
   0x2   :  { %11 = vsyncpa [#allocation4], 0 }
   0x3   :  { %13 = vsyncpa [#allocation4 + $0x1], 0  ;;  %s485_s12 = smov 0   ;;  %s487_s13 = smov 0  }
   0x4   :  { %s489_s14 = smov 0   ;;  %s491_s15 = smov 0  }
   0x5 LB: > { %s506_s16 = sadd.s32 4294967295, %s461_s15   ;;  %s303_s17 = sadd.s32 4294967294, %s461_s15   ;;  %s461_s15 = sphi %s491_s15, %s673_s15   ;;  %s457_s14 = sphi %s489_s14, %s672_s14   ;;  %s453_s13 = sphi %s487_s13, %s671_s13   ;;  %s449_s12 = sphi %s485_s12, %s670_s12  }
   0x6   : > { %s510_s18 = sadd.s32 1, %s461_s15   ;;  %s26_s19 = sadd.s32 1, %s457_s14 }
   0x7   : > { %s23_s20 = ssub.s32 %s461_s15, %s510_s18  ;;  %p33_p0 = scmp.ne.s32.totalorder %s457_s14, %s453_s13 }
   0x8   : > { %p24_p1 = scmp.eq.s32.totalorder %s23_s20, 0  ;;  %p34_p2 = scmp.eq.s32.totalorder %s461_s15, 0 }
   0x9   : > { %p39_p3 = scmp.ne.s32.totalorder %s453_s13, %s449_s12  ;;  %p40_p4 = scmp.eq.s32.totalorder %s506_s16, 0 }
   0xa   : > { %s522_s21 = scalar_select %p24_p1, %s457_s14, %s26_s19  }
   0xb   : > { %p524_p5 = por %p34_p2, %p33_p0  ;;  %p528_p6 = por %p40_p4, %p39_p3 }
   0xc   : > { %p105_p7 = scmp.eq.s32.totalorder %s506_s16, 1  ;;  %p111_p8 = scmp.eq.s32.totalorder %s303_s17, 1 }
   0xd   : > { %p329_p10 = scmp.lt.s32.totalorder %s461_s15, 2  ;;  %s137_s26 = sand.u32 1, %s457_s14  }
   0xe   : > { %p535_p11 = por %p105_p7, %p33_p0  ;;  %p539_p12 = por %p111_p8, %p39_p3 }
   0xf   : > { %s307_s27 = sshll.u32 %s461_s15, 7  ;;  %s306_s28 = sshll.u32 %s137_s26, 3 }
  0x10   : > { %s662_s24 = scalar_select %p535_p11, 1, 0 }
  0x11   : > { %s663_s25 = scalar_select %p539_p12, 1, 0 }
  0x12   : > { %s548_s4 = scalar_lea.hbm %s655_s0, %s307_s27  ;;  %s141_s5 = scalar_lea.vmem [#allocation2], %s306_s28 }
  0x13   : > { %s148_s6 = sshll.u32 %s141_s5, 4  ;;  %p552_p13 = pnand %p329_p10, %p524_p5  ;;  %s556_s6 = int_to_ptr.vmem [resolvable:$true] %s148_s6 }
  0x14   : > { %s138_s8 = scalar_lea.sflag [#allocation3], %s137_s26  ;;  %s365_s9 = scalar_lea.hbm %s548_s4, 128 }
  0x15   : > { %p366_p2 = scmp.ne.s32.totalorder %s548_s4, %s365_s9  ;;  %p367_p3 = pneg %p552_p13 }
  0x16   : > { %s370_s17 = scalar_lea.hbm %s655_s0, 256  ;;  %p371_p5 = scmp.lt.u32.totalorder %s548_s4, %s655_s0 }
  0x17   : > { %p368_p4 = pnand %p367_p3, %p366_p2  ;;  %p372_p8 = scmp.lt.u32.totalorder %s370_s17, %s365_s9 }
  0x18   : > { %p374_p9 = scmp.lt.u32.totalorder %s365_s9, %s548_s4 }
  0x19   : > { %p369_p7 = pneg %p368_p4  ;;  %p373_p10 = por %p372_p8, %p371_p5 }
  0x1b   : > { %p375_p0 = por %p374_p9, %p373_p10 }
  0x1d   : > { %p376_p1 = pnand %p375_p0, %p369_p7 }
  0x1f   : > { %379 = shalt.err (!%p376_p1)
}
  0x20   : > { %s380_s22 = scalar_lea.vmem %s556_s6, 128  ;;  %s463_s26 = smov [#allocation2]  }
  0x21   : > { %p381_p2 = scmp.ne.s32.totalorder %s556_s6, %s380_s22  ;;  %s385_s27 = sshll.u32 %s463_s26, 4  ;;  %s386_s27 = int_to_ptr.vmem [resolvable:$false] %s385_s27 }
  0x22   : > { %s387_s28 = scalar_lea.vmem %s386_s27, 256  ;;  %p388_p11 = scmp.lt.s32.totalorder %s556_s6, %s386_s27 }
  0x23   : > { %p383_p4 = pnand %p381_p2, %p367_p3  ;;  %p389_p5 = scmp.lt.s32.totalorder %s387_s28, %s380_s22 }
  0x25   : > { %p384_p12 = pneg %p383_p4  ;;  %p390_p8 = por %p389_p5, %p388_p11 }
  0x27   : > { %p391_p9 = pnand %p390_p8, %p384_p12 }
  0x29   : > { %394 = shalt.err (!%p391_p9)
}
  0x2a   : > { %324 = dma.hbm_to_vmem [thread:$0]  (!%p552_p13), %s548_s4, 128, %s556_s6, %s138_s8  }
  0x2b   : > { %p665_p0 = scmp.lt.s32.totalorder %s461_s15, 3  ;;  %p666_p1 = scmp.ge.s32.totalorder %s461_s15, 1 }
  0x2d   : > { %p154_p3 = pnand %p666_p1, %p665_p0 }
  0x2e   : > { %s590_s29 = sand.u32 (!%p154_p3), 1, %s453_s13  }
  0x2f   : > { %157 = sbr.rel (%p154_p3) target bundleno = 383 (0x17f), region = 32  ;;  %s309_s30 = sshll.u32 (!%p154_p3), %s590_s29, 3 }
  0x30   : > { %s160_s5 = scalar_lea.sflag (!%p154_p3), [#allocation3], %s590_s29  ;;  %s163_s9 = scalar_lea.vmem (!%p154_p3), [#allocation2], %s309_s30 }
  0x36   : > { %440 = dma.done.wait (%p528_p6), %s160_s5, 128  }
  0x37   : > { %442 = vsyncadd (%p528_p6), %s160_s5, 4294967168  ;;  %vm189_vm0 = vcmask 261120   ;;  %v186_v0 = vld [vmem:[%s163_s9] sm:$0xff]  ;;  %s314_s8 = sshll.u32 %s506_s16, 7  ;;  %s185_s10 = scalar_lea.vmem [#allocation5], %s309_s30 }
  0x38   : > { %v190_v1 = vsel %vm189_vm0, %v186_v0, 0.0  ;;  %v311_v11 = vld [vmem:[%s656_s1] ss:$0 sm:$0xff]  ;;  %s233_s11 = sshll.u32 %s185_s10, 4  ;;  %s610_s20 = scalar_lea.hbm %s658_s3, %s314_s8  ;;  %s612_s11 = int_to_ptr.vmem [resolvable:$true] %s233_s11 }
  0x39   : > { %191 = vadd.xlane.f32.xlu0 %v190_v1  ;;  %v312_v13 = vld [vmem:[%s657_s2] ss:$0 sm:$0xff]  ;;  %s220_s22 = scalar_lea.sflag [#allocation4], %s590_s29  ;;  %s395_s26 = scalar_lea.vmem %s612_s11, 128 }
  0x3a   : > { %p396_p6 = scmp.ne.s32.totalorder %s612_s11, %s395_s26  ;;  %p667_p11 = scmp.ne.s32.totalorder %s662_s24, 0 }
  0x3b   : > { %s464_s16 = smov [#allocation5]  }
  0x3c   : > { %p397_p12 = pnand %p396_p6, %p667_p11  ;;  %s399_s27 = sshll.u32 %s464_s16, 4  ;;  %s400_s27 = int_to_ptr.vmem [resolvable:$false] %s399_s27 }
  0x3d   : > { %s401_s28 = scalar_lea.vmem %s400_s27, 256  ;;  %p402_p7 = scmp.lt.s32.totalorder %s612_s11, %s400_s27 }
  0x3e   : > { %p398_p13 = pneg %p397_p12  ;;  %p403_p10 = scmp.lt.s32.totalorder %s401_s28, %s395_s26 }
  0x40   : > { %p404_p2 = por %p403_p10, %p402_p7 }
  0x42   : > { %p405_p4 = pnand %p404_p2, %p398_p13 }
  0xc6   : > { %v192_v2 = vpop.xlane.xlu0 %191 }
  0xc7   : > { %v194_v3 = vmul.f32 0.03125, %v192_v2 }
  0xc9   : > { %v195_v4 = vsub.f32 %v186_v0, %v194_v3 }
  0xcb   : > { %v196_v5 = vmul.f32 %v195_v4, %v195_v4 }
  0xcd   : > { %v197_v6 = vsel %vm189_vm0, %v196_v5, 0.0 }
  0xce   : > { %198 = vadd.xlane.f32.xlu0 %v197_v6 }
 0x15b   : > { %v199_v7 = vpop.xlane.xlu0 %198 }
 0x15c   : > { %v200_v8 = vmul.f32 0.03125, %v199_v7 }
 0x15e   : > { %v201_v9 = vadd.f32 1e-12, %v200_v8 }
 0x160   : > { %363 = vrsqrt.f32 %v201_v9 }
 0x16a   : > { %v364_v10 = vpop.eup %363 }
 0x16b   : > { %v203_v12 = vmul.f32 %v364_v10, %v195_v4 }
 0x16d   : > { %v210_v14 = vmul.f32 %v311_v11, %v203_v12 }
 0x16f   : > { %v217_v15 = vadd.f32 %v312_v13, %v210_v14 }
 0x171   : > { %218 = vst.msk [vmem:[%s185_s10] sm:$0xff] %vm189_vm0, %v217_v15 }
 0x172   : > { %408 = shalt.err (!%p405_p4)
}
 0x173   : > { %s409_s29 = scalar_lea.hbm %s610_s20, 128  ;;  %s413_s9 = scalar_lea.hbm %s658_s3, 256 }
 0x174   : > { %p410_p5 = scmp.ne.s32.totalorder %s610_s20, %s409_s29  ;;  %p414_p0 = scmp.lt.u32.totalorder %s610_s20, %s658_s3 }
 0x175   : > { %p415_p1 = scmp.lt.u32.totalorder %s413_s9, %s409_s29  ;;  %p417_p6 = scmp.lt.u32.totalorder %s409_s29, %s610_s20 }
 0x176   : > { %p411_p8 = pnand %p410_p5, %p667_p11 }
 0x177   : > { %p416_p3 = por %p415_p1, %p414_p0 }
 0x178   : > { %p412_p9 = pneg %p411_p8 }
 0x179   : > { %p418_p12 = por %p417_p6, %p416_p3 }
 0x17b   : > { %p419_p13 = pnand %p418_p12, %p412_p9 }
 0x17d   : > { %422 = shalt.err (!%p419_p13)
}
 0x17e   : > { %319 = dma.vmem_to_hbm [thread:$0]  (%p667_p11), %s612_s11, 128, %s610_s20, %s220_s22  }
 0x17f PF: > { %s245_s6 = sand.u32 1, %s449_s12   ;;  %p668_p7 = scmp.ne.s32.totalorder %s663_s25, 0 }
 0x180   : > { %p669_p10 = scmp.ge.s32.totalorder %s461_s15, 2  ;;  %s246_s7 = scalar_lea.sflag [#allocation4], %s245_s6 }
 0x182   : > { %p326_p2 = pnand %p669_p10, %p668_p7 }
 0x184   : > { %444 = dma.done.wait (!%p326_p2), %s246_s7, 128  }
 0x185   : > { %446 = vsyncadd (!%p326_p2), %s246_s7, 4294967168  ;;  %p16_p4 = scmp.ge.s32.totalorder %s510_s18, 4   ;;  %s670_s12 = smov %s453_s13 }
 0x186   : > { %s671_s13 = smov %s457_s14  ;;  %s672_s14 = smov %s522_s21 }
 0x187   : > { %s673_s15 = smov %s510_s18  ;;  %18 = sbr.rel (!%p16_p4) target bundleno = 5 (0x5), region = 77 }
 0x18e   :  { %251 = vsyncpa [#allocation3], 1 }
 0x18f   :  { %253 = vsyncpa [#allocation3 + $0x1], 1 }
 0x190   :  { %254 = vsyncpa [#allocation4], 1 }
 0x191   :  { %256 = vsyncpa [#allocation4 + $0x1], 1 }

</bundles_post_ra>
